<compile_context>
chip_gen: v7x
topology: tpu7x:2x2x1
jax: 0.10.0
libtpu: 0.0.40
codegen_flags: <defaults>
</compile_context>

<pallas_src>
import math

import jax
import jax.numpy as jnp
from jax.experimental import pallas as pl
from jax.experimental.pallas import tpu as pltpu


def _leaky_relu(x, negative_slope=0.01):
    # matches torch.nn.LeakyReLU(negative_slope=0.01)
    return jnp.where(x > 0, x, negative_slope * x)


def _round_up(n, m):
    return ((n + m - 1) // m) * m


def mlp_kernel(x_ref, w1_ref, b1_ref, w2_ref, b2_ref, w3_ref, b3_ref, o_ref):
    # x tile arrives as raw f32 [TB, IN]; cast to bf16 only to feed the MXU.
    x = x_ref[...].astype(jnp.bfloat16)

    # dense1 + LeakyReLU (f32 epilogue; valid on v5e's f32-only VPU/EUP path)
    h1 = jnp.dot(x, w1_ref[...], preferred_element_type=jnp.float32) + b1_ref[...]
    h1 = _leaky_relu(h1)

    # dense2 + LeakyReLU
    h2 = jnp.dot(h1.astype(jnp.bfloat16), w2_ref[...],
                 preferred_element_type=jnp.float32) + b2_ref[...]
    h2 = _leaky_relu(h2)

    # dropout(p=0.2): identity in eval mode.

    # dense3: output has only the real class lanes -> no masking needed.
    logits = jnp.dot(h2.astype(jnp.bfloat16), w3_ref[...],
                     preferred_element_type=jnp.float32) + b3_ref[...]

    # LogSoftmax over the class axis, numerically stable.
    m = jnp.max(logits, axis=1, keepdims=True)
    shifted = logits - m
    lse = jnp.log(jnp.sum(jnp.exp(shifted), axis=1, keepdims=True))
    o_ref[...] = (shifted - lse).astype(o_ref.dtype)


def prepare_params(params):
    """One-time prep: pad hidden dims to a lane-dense multiple of 128, cast weights to bf16.

    Zero padding keeps valid outputs exact: padded h1/h2 lanes are 0 (zero weight
    cols + zero bias, LeakyReLU(0)=0) and padded weight rows contribute 0 downstream.
    The x input dim of w1 and the class dim of w3/b3 stay unpadded so the HBM-boundary
    streams stay narrow.
    """
    IN, HID = params["w1"].shape
    OP = params["w3"].shape[1]
    HID_P = _round_up(HID, 128)

    def pad2(a, rows, cols, dtype):
        return jnp.pad(a, ((0, rows - a.shape[0]), (0, cols - a.shape[1]))).astype(dtype)

    return {
        "w1": pad2(params["w1"], IN, HID_P, jnp.bfloat16),
        "b1": pad2(params["b1"], 1, HID_P, jnp.float32),
        "w2": pad2(params["w2"], HID_P, HID_P, jnp.bfloat16),
        "b2": pad2(params["b2"], 1, HID_P, jnp.float32),
        "w3": pad2(params["w3"], HID_P, OP, jnp.bfloat16),
        "b3": pad2(params["b3"], 1, OP, jnp.float32),
    }


def mlp_forward(x, prepared, *, block_b=2048):
    """x: [B, IN] f32.  prepared: output of prepare_params (padded/bf16 weights)."""
    B, IN = x.shape
    IN_W, HID_P = prepared["w1"].shape
    assert IN == IN_W, (IN, IN_W)
    OP = prepared["w3"].shape[1]

    # Batch tile: sublane-aligned, large enough to amortize the ~0.35 us per-step
    # overhead, but sized so the grid keeps >= 2 steps when B allows it so the
    # "parallel" batch axis can shard across v7x's two TensorCores.
    B8 = _round_up(B, 8)
    half = _round_up(-(-B8 // 2), 8)
    TB = max(8, min(block_b, half))
    B_P = _round_up(B8, TB)
    grid = (B_P // TB,)

    x_p = x if B_P == B else jnp.pad(x, ((0, B_P - B), (0, 0)))

    # VMEM budget: resident weights/biases + double-buffered x/out streams +
    # f32/bf16 intermediates, with headroom; capped under v7x's 64 MiB physical VMEM.
    weight_bytes = (IN * HID_P + HID_P * HID_P + HID_P * OP) * 2
    bias_bytes = (2 * HID_P + OP) * 4
    stream_bytes = 2 * TB * IN * 4 + 2 * TB * OP * 4
    scratch_bytes = 4 * TB * HID_P * 4
    vmem_bytes = int(min(
        48 * 1024 * 1024,
        2 * (weight_bytes + bias_bytes + stream_bytes + scratch_bytes) + (8 << 20),
    ))

    cost = pl.CostEstimate(
        flops=2 * B_P * (IN * HID_P + HID_P * HID_P + HID_P * OP),
        transcendentals=B_P * (OP + 1),
        bytes_accessed=B_P * IN * 4 + weight_bytes + bias_bytes + B_P * OP * 4,
    )

    resident = lambda shp: pl.BlockSpec(shp, lambda i: (0, 0))

    out = pl.pallas_call(
        mlp_kernel,
        grid=grid,
        out_shape=jax.ShapeDtypeStruct((B_P, OP), jnp.float32),
        in_specs=[
            pl.BlockSpec((TB, IN), lambda i: (i, 0)),   # x: streamed, raw f32, unpadded lanes
            resident((IN, HID_P)),                      # w1: VMEM resident
            resident((1, HID_P)),                       # b1
            resident((HID_P, HID_P)),                   # w2
            resident((1, HID_P)),                       # b2
            resident((HID_P, OP)),                      # w3
            resident((1, OP)),                          # b3
        ],
        out_specs=pl.BlockSpec((TB, OP), lambda i: (i, 0)),
        compiler_params=pltpu.CompilerParams(
            dimension_semantics=("parallel",),
            vmem_limit_bytes=vmem_bytes,
        ),
        cost_estimate=cost,
    )(x_p, prepared["w1"], prepared["b1"], prepared["w2"], prepared["b2"],
      prepared["w3"], prepared["b3"])

    return out[:B]


def init_params(key, inp_shape, hid_shape, op_shape):
    """Init mirroring the PyTorch module's __init__.

    dense1/dense2 weights: kaiming_uniform_ (a=0 -> bound = sqrt(6/fan_in)).
    dense3 weight + all biases: PyTorch Linear default uniform(-1/sqrt(fan_in), ...).
    Weights stored transposed to [in, out]; biases as [1, out] rows.
    """
    ks = jax.random.split(key, 6)

    def kaiming_uniform(k, fan_in, fan_out):
        bound = math.sqrt(6.0 / fan_in)
        return jax.random.uniform(k, (fan_in, fan_out), jnp.float32, -bound, bound)

    def default_uniform(k, shape, fan_in):
        bound = 1.0 / math.sqrt(fan_in)
        return jax.random.uniform(k, shape, jnp.float32, -bound, bound)

    return {
        "w1": kaiming_uniform(ks[0], inp_shape, hid_shape),
        "b1": default_uniform(ks[1], (1, hid_shape), inp_shape),
        "w2": kaiming_uniform(ks[2], hid_shape, hid_shape),
        "b2": default_uniform(ks[3], (1, hid_shape), hid_shape),
        "w3": default_uniform(ks[4], (hid_shape, op_shape), hid_shape),
        "b3": default_uniform(ks[5], (1, op_shape), hid_shape),
    }


def mlp_reference(x, params):
    """Pure-JAX f32 reference (eval-mode forward)."""
    h1 = _leaky_relu(x @ params["w1"] + params["b1"])
    h2 = _leaky_relu(h1 @ params["w2"] + params["b2"])
    logits = h2 @ params["w3"] + params["b3"]
    m = jnp.max(logits, axis=1, keepdims=True)
    shifted = logits - m
    return shifted - jnp.log(jnp.sum(jnp.exp(shifted), axis=1, keepdims=True))


if __name__ == "__main__":
    inp_shape, hid_shape, op_shape = 32, 64, 16
    batch = 8

    key = jax.random.PRNGKey(0)
    k_x, k_p = jax.random.split(key)

    x = jax.random.normal(k_x, (batch, inp_shape), dtype=jnp.float32)
    params = init_params(k_p, inp_shape, hid_shape, op_shape)

    # One-time parameter prep (padding + bf16 cast) hoisted off the per-call path.
    prepared = prepare_params(params)
    prepared = jax.tree_util.tree_map(jax.block_until_ready, prepared)

    out = mlp_forward(x, prepared)
    out = jax.block_until_ready(out)

    assert out.shape == (batch, op_shape), out.shape

    # log-softmax rows exponentiate-sum to 1
    row_sums = jnp.sum(jnp.exp(out), axis=1)
    assert jnp.allclose(row_sums, jnp.ones_like(row_sums), atol=1e-4)

    # matches f32 reference up to bf16-matmul rounding
    ref = mlp_reference(x, params)
    assert jnp.allclose(out, ref, atol=1e-1), float(jnp.max(jnp.abs(out - ref)))

    print("KERNEL_OK")
</pallas_src>

<mosaic_0001>
module attributes {stable_mosaic.version = 11 : i64} {
  func.func @mlp_kernel(%arg0: i32, %arg1: memref<8x32xf32, #tpu.memory_space<vmem>>, %arg2: memref<32x128xbf16, #tpu.memory_space<vmem>>, %arg3: memref<1x128xf32, #tpu.memory_space<vmem>>, %arg4: memref<128x128xbf16, #tpu.memory_space<vmem>>, %arg5: memref<1x128xf32, #tpu.memory_space<vmem>>, %arg6: memref<128x16xbf16, #tpu.memory_space<vmem>>, %arg7: memref<1x16xf32, #tpu.memory_space<vmem>>, %arg8: memref<8x16xf32, #tpu.memory_space<vmem>>) attributes {dimension_semantics = [#tpu.dimension_semantics<parallel>], iteration_bounds = array<i64: 1>, scalar_prefetch = 0 : i64, scratch_operands = 0 : i64, tpu.core_type = #tpu.core_type<tc>, window_params = [{transform_indices = @transform_0, window_bounds = array<i64: 8, 32>}, {pipeline_mode = #tpu.pipeline_mode<synchronous>, transform_indices = @transform_1, window_bounds = array<i64: 32, 128>}, {pipeline_mode = #tpu.pipeline_mode<synchronous>, transform_indices = @transform_2, window_bounds = array<i64: 1, 128>}, {pipeline_mode = #tpu.pipeline_mode<synchronous>, transform_indices = @transform_3, window_bounds = array<i64: 128, 128>}, {pipeline_mode = #tpu.pipeline_mode<synchronous>, transform_indices = @transform_4, window_bounds = array<i64: 1, 128>}, {pipeline_mode = #tpu.pipeline_mode<synchronous>, transform_indices = @transform_5, window_bounds = array<i64: 128, 16>}, {pipeline_mode = #tpu.pipeline_mode<synchronous>, transform_indices = @transform_6, window_bounds = array<i64: 1, 16>}, {transform_indices = @transform_7, window_bounds = array<i64: 8, 16>}]} {
    %c0 = arith.constant 0 : index
    %c0_0 = arith.constant 0 : index
    %0 = vector.load %arg1[%c0, %c0_0] : memref<8x32xf32, #tpu.memory_space<vmem>>, vector<8x32xf32>
    %1 = arith.truncf %0 : vector<8x32xf32> to vector<8x32xbf16>
    %c0_1 = arith.constant 0 : index
    %c0_2 = arith.constant 0 : index
    %2 = vector.load %arg2[%c0_1, %c0_2] : memref<32x128xbf16, #tpu.memory_space<vmem>>, vector<32x128xbf16>
    %cst = arith.constant dense<0.000000e+00> : vector<8x128xf32>
    %3 = tpu.matmul %1, %2, %cst {dimension_numbers = #tpu.dot_dimension_numbers<[1], [0], [0], [1], [0, 0, 1, 1], [], []>} : vector<8x32xbf16>, vector<32x128xbf16>, vector<8x128xf32> -> vector<8x128xf32>
    %c0_3 = arith.constant 0 : index
    %c0_4 = arith.constant 0 : index
    %4 = vector.load %arg3[%c0_3, %c0_4] : memref<1x128xf32, #tpu.memory_space<vmem>>, vector<1x128xf32>
    %5 = vector.broadcast %4 : vector<1x128xf32> to vector<8x128xf32>
    %6 = arith.addf %3, %5 : vector<8x128xf32>
    %cst_5 = arith.constant 0.000000e+00 : f32
    %7 = vector.broadcast %cst_5 : f32 to vector<8x128xf32>
    %8 = arith.cmpf ogt, %6, %7 : vector<8x128xf32>
    %cst_6 = arith.constant 0.00999999977 : f32
    %9 = vector.broadcast %cst_6 : f32 to vector<8x128xf32>
    %10 = arith.mulf %9, %6 : vector<8x128xf32>
    %11 = arith.select %8, %6, %10 : vector<8x128xi1>, vector<8x128xf32>
    %12 = arith.truncf %11 : vector<8x128xf32> to vector<8x128xbf16>
    %c0_7 = arith.constant 0 : index
    %c0_8 = arith.constant 0 : index
    %13 = vector.load %arg4[%c0_7, %c0_8] : memref<128x128xbf16, #tpu.memory_space<vmem>>, vector<128x128xbf16>
    %cst_9 = arith.constant dense<0.000000e+00> : vector<8x128xf32>
    %14 = tpu.matmul %12, %13, %cst_9 {dimension_numbers = #tpu.dot_dimension_numbers<[1], [0], [0], [1], [0, 0, 1, 1], [], []>} : vector<8x128xbf16>, vector<128x128xbf16>, vector<8x128xf32> -> vector<8x128xf32>
    %c0_10 = arith.constant 0 : index
    %c0_11 = arith.constant 0 : index
    %15 = vector.load %arg5[%c0_10, %c0_11] : memref<1x128xf32, #tpu.memory_space<vmem>>, vector<1x128xf32>
    %16 = vector.broadcast %15 : vector<1x128xf32> to vector<8x128xf32>
    %17 = arith.addf %14, %16 : vector<8x128xf32>
    %cst_12 = arith.constant 0.000000e+00 : f32
    %18 = vector.broadcast %cst_12 : f32 to vector<8x128xf32>
    %19 = arith.cmpf ogt, %17, %18 : vector<8x128xf32>
    %cst_13 = arith.constant 0.00999999977 : f32
    %20 = vector.broadcast %cst_13 : f32 to vector<8x128xf32>
    %21 = arith.mulf %20, %17 : vector<8x128xf32>
    %22 = arith.select %19, %17, %21 : vector<8x128xi1>, vector<8x128xf32>
    %23 = arith.truncf %22 : vector<8x128xf32> to vector<8x128xbf16>
    %c0_14 = arith.constant 0 : index
    %c0_15 = arith.constant 0 : index
    %24 = vector.load %arg6[%c0_14, %c0_15] : memref<128x16xbf16, #tpu.memory_space<vmem>>, vector<128x16xbf16>
    %cst_16 = arith.constant dense<0.000000e+00> : vector<8x16xf32>
    %25 = tpu.matmul %23, %24, %cst_16 {dimension_numbers = #tpu.dot_dimension_numbers<[1], [0], [0], [1], [0, 0, 1, 1], [], []>} : vector<8x128xbf16>, vector<128x16xbf16>, vector<8x16xf32> -> vector<8x16xf32>
    %c0_17 = arith.constant 0 : index
    %c0_18 = arith.constant 0 : index
    %26 = vector.load %arg7[%c0_17, %c0_18] : memref<1x16xf32, #tpu.memory_space<vmem>>, vector<1x16xf32>
    %27 = vector.broadcast %26 : vector<1x16xf32> to vector<8x16xf32>
    %28 = arith.addf %25, %27 : vector<8x16xf32>
    %cst_19 = arith.constant dense<0xFF800000> : vector<8xf32>
    %29 = vector.multi_reduction <maximumf>, %28, %cst_19 [1] : vector<8x16xf32> to vector<8xf32>
    %30 = vector.shape_cast %29 : vector<8xf32> to vector<8x1xf32>
    %31 = vector.broadcast %30 : vector<8x1xf32> to vector<8x16xf32>
    %32 = arith.subf %28, %31 : vector<8x16xf32>
    %33 = math.exp %32 : vector<8x16xf32>
    %cst_20 = arith.constant dense<0.000000e+00> : vector<8xf32>
    %34 = vector.multi_reduction <add>, %33, %cst_20 [1] : vector<8x16xf32> to vector<8xf32>
    %35 = vector.shape_cast %34 : vector<8xf32> to vector<8x1xf32>
    %36 = math.log %35 : vector<8x1xf32>
    %37 = vector.broadcast %36 : vector<8x1xf32> to vector<8x16xf32>
    %38 = arith.subf %32, %37 : vector<8x16xf32>
    %c0_21 = arith.constant 0 : index
    %c0_22 = arith.constant 0 : index
    %39 = vector.load %arg8[%c0_21, %c0_22] : memref<8x16xf32, #tpu.memory_space<vmem>>, vector<8x16xf32>
    tpu.vector_store %arg8[%c0_21, %c0_22], %38 {strides = array<i32>} : memref<8x16xf32, #tpu.memory_space<vmem>>, vector<8x16xf32>,
    return
  }
  func.func @transform_0(%arg0: i32) -> (i32, i32) {
    %c0_i32 = arith.constant 0 : i32
    %c0_i32_0 = arith.constant 0 : i32
    return %arg0, %c0_i32 : i32, i32
  }
  func.func @transform_1(%arg0: i32) -> (i32, i32) {
    %c0_i32 = arith.constant 0 : i32
    %c0_i32_0 = arith.constant 0 : i32
    %c0_i32_1 = arith.constant 0 : i32
    return %c0_i32, %c0_i32_0 : i32, i32
  }
  func.func @transform_2(%arg0: i32) -> (i32, i32) {
    %c0_i32 = arith.constant 0 : i32
    %c0_i32_0 = arith.constant 0 : i32
    %c0_i32_1 = arith.constant 0 : i32
    return %c0_i32, %c0_i32_0 : i32, i32
  }
  func.func @transform_3(%arg0: i32) -> (i32, i32) {
    %c0_i32 = arith.constant 0 : i32
    %c0_i32_0 = arith.constant 0 : i32
    %c0_i32_1 = arith.constant 0 : i32
    return %c0_i32, %c0_i32_0 : i32, i32
  }
  func.func @transform_4(%arg0: i32) -> (i32, i32) {
    %c0_i32 = arith.constant 0 : i32
    %c0_i32_0 = arith.constant 0 : i32
    %c0_i32_1 = arith.constant 0 : i32
    return %c0_i32, %c0_i32_0 : i32, i32
  }
  func.func @transform_5(%arg0: i32) -> (i32, i32) {
    %c0_i32 = arith.constant 0 : i32
    %c0_i32_0 = arith.constant 0 : i32
    %c0_i32_1 = arith.constant 0 : i32
    return %c0_i32, %c0_i32_0 : i32, i32
  }
  func.func @transform_6(%arg0: i32) -> (i32, i32) {
    %c0_i32 = arith.constant 0 : i32
    %c0_i32_0 = arith.constant 0 : i32
    %c0_i32_1 = arith.constant 0 : i32
    return %c0_i32, %c0_i32_0 : i32, i32
  }
  func.func @transform_7(%arg0: i32) -> (i32, i32) {
    %c0_i32 = arith.constant 0 : i32
    %c0_i32_0 = arith.constant 0 : i32
    return %arg0, %c0_i32 : i32, i32
  }
}

</mosaic_0001>

<bundles_post_ra>
// kernel: tpu_custom_call.1
= control target key start
LH: loop header
LB: loop body
LE: loop exit
PB: predicated region body
PF: predicated region fallthrough
CT: control target
= control target key end

     0   :  { %12 = vsyncpa [#allocation3], 0  ;;  %s691_s0 = inlined_call_operand.hbm [shape: f32[8,32], index: 0, kind: input, shape index: {}]   ;;  %s692_s1 = inlined_call_operand.vmem [shape: bf16[32,128], index: 1, kind: input, shape index: {}]   ;;  %s693_s2 = inlined_call_operand.vmem [shape: f32[1,128], index: 2, kind: input, shape index: {}]   ;;  %s694_s3 = inlined_call_operand.vmem [shape: bf16[128,128], index: 3, kind: input, shape index: {}]   ;;  %s695_s4 = inlined_call_operand.vmem [shape: f32[1,128], index: 4, kind: input, shape index: {}]   ;;  %s696_s5 = inlined_call_operand.vmem [shape: bf16[128,16], index: 5, kind: input, shape index: {}]   ;;  %s697_s6 = inlined_call_operand.vmem [shape: f32[1,16], index: 6, kind: input, shape index: {}]   ;;  %s698_s7 = inlined_call_operand.hbm [shape: f32[8,16], index: 7, kind: output, shape index: {}]  }
   0x1   :  { %13 = vsyncpa [#allocation4], 0  ;;  %s533_s24 = smov [#allocation2]   ;;  %s485_s28 = scalar_lea.hbm %s691_s0, 128 }
   0x2   :  { %s20_s25 = sshll.u32 %s533_s24, 4  ;;  %p486_p0 = scmp.ne.s32.totalorder %s691_s0, %s485_s28  ;;  %s21_s25 = int_to_ptr.vmem [resolvable:$true] %s20_s25 }
   0x3   :  { %p489_p1 = scmp.lt.u32.totalorder %s485_s28, %s691_s0 }
   0x5   :  { %p491_p2 = pnand %p489_p1, %p486_p0 }
   0x7   :  { %494 = shalt.err (!%p491_p2)
}
   0x8   :  { %s495_s10 = scalar_lea.vmem %s21_s25, 128  ;;  %p500_p4 = scmp.lt.s32.totalorder %s21_s25, %s21_s25 }
   0x9   :  { %p496_p3 = scmp.ne.s32.totalorder %s21_s25, %s495_s10  ;;  %p501_p5 = scmp.lt.s32.totalorder %s495_s10, %s495_s10 }
   0xb   :  { %p502_p6 = por %p501_p5, %p500_p4 }
   0xd   :  { %p503_p7 = pnand %p502_p6, %p496_p3 }
   0xf   :  { %506 = shalt.err (!%p503_p7)
}
  0x10   :  { %23 = dma.hbm_to_vmem [thread:$0]  %s691_s0, 128, %s21_s25, [#allocation3]  }
  0x11   :  { %529 = dma.done.wait [#allocation3], 128  }
  0x12   :  { %530 = vsyncadd [#allocation3], 4294967168  ;;  %v534_v0 = vmov 0.0   ;;  %vm535_vm0 = vmmov 0   ;;  %v463_v1 = vld [vmem:[%s692_s1] sm:$0xff]   ;;  %v464_v2 = vld [vmem:[%s692_s1 + $0x8] sm:$0xff]  }
  0x13   :  { %411 = vmatprep.subr.bf16.mxu0 %v534_v0  ;;  %415 = vmatprep.mubr.msk.bf16.mxu0 %vm535_vm0, %v534_v0  ;;  %v40_v3 = vld [vmem:[#allocation2] sm:$0xff]  ;;  %v466_v6 = vld [vmem:[%s694_s3 + $0x8] sm:$0xff]   ;;  %vm65_vm1 = vcmask 261120   ;;  %v467_v7 = vld [vmem:[%s694_s3 + $0x10] sm:$0xff]   ;;  %vm339_vm4 = vcmask 130048  }
  0x14   :  { %419 = vmatprep.subr.bf16.mxu1 %v534_v0  ;;  %435 = vmatprep.mubr.msk.bf16.mxu1 %vm535_vm0, %v534_v0  ;;  %v465_v4 = vld [vmem:[%s694_s3] sm:$0xff]   ;;  %v41_v5 = vpack.c.bf16 %v40_v3, %v40_v3  ;;  %v468_v8 = vld [vmem:[%s694_s3 + $0x18] sm:$0xff]   ;;  %v470_v10 = vld [vmem:[%s694_s3 + $0x28] sm:$0xff]  }
  0x15   :  { %412 = vmatpush3.bf16.msra.mxu0 %v463_v1  ;;  %420 = vmatpush3.bf16.msra.mxu1 %v465_v4  ;;  %v469_v9 = vld [vmem:[%s694_s3 + $0x20] sm:$0xff]   ;;  %v471_v11 = vld [vmem:[%s694_s3 + $0x30] sm:$0xff]   ;;  %v472_v12 = vld [vmem:[%s694_s3 + $0x38] sm:$0xff]  }
  0x16   :  { %413 = vmatprep.subr.bf16.mxu0 %v534_v0  ;;  %421 = vmatprep.subr.bf16.mxu1 %v534_v0  ;;  %v473_v13 = vld [vmem:[%s696_s5] sm:$0xff]   ;;  %v474_v14 = vld [vmem:[%s696_s5 + $0x8] sm:$0xff]   ;;  %v475_v15 = vld [vmem:[%s696_s5 + $0x10] sm:$0xff]  }
  0x17   :  { %v476_v16 = vld [vmem:[%s696_s5 + $0x18] sm:$0xff]   ;;  %v477_v17 = vld [vmem:[%s696_s5 + $0x20] sm:$0xff]   ;;  %v478_v18 = vld [vmem:[%s696_s5 + $0x28] sm:$0xff]  }
  0x18   :  { %v368_v19 = vld [vmem:[%s693_s2] ss:$0 sm:$0xff]  ;;  %v479_v28 = vld [vmem:[%s696_s5 + $0x30] sm:$0xff]   ;;  %v480_v29 = vld [vmem:[%s696_s5 + $0x38] sm:$0xff]  }
  0x19   :  { %414 = vmatpush3.bf16.msra.mxu0 %v464_v2  ;;  %422 = vmatpush3.bf16.msra.mxu1 %v466_v6  ;;  %v372_v30 = vld [vmem:[%s695_s4] ss:$0 sm:$0xff]  ;;  %s536_s4 = smov [#allocation5]  }
  0x1a   :  { %439 = vmatprep.subr.bf16.mxu0 %v534_v0  ;;  %423 = vmatprep.subr.bf16.mxu1 %v534_v0  ;;  %v381_v39 = vld [vmem:[%s697_s6] ss:$0 sm:$0xff]  ;;  %s359_s5 = sshll.u32 %s536_s4, 4  ;;  %s360_s5 = int_to_ptr.vmem [resolvable:$true] %s359_s5 }
  0x1b   :  { %s507_s6 = scalar_lea.vmem %s360_s5, 128  ;;  %p512_p9 = scmp.lt.s32.totalorder %s360_s5, %s360_s5 }
  0x1c   :  { %416 = vmatmul.mubr.msk.bf16.vlgmr.msra.gmra.mrb[0].mxu0 %vm65_vm1, %v41_v5  ;;  %p508_p8 = scmp.ne.s32.totalorder %s360_s5, %s507_s6  ;;  %p513_p10 = scmp.lt.s32.totalorder %s507_s6, %s507_s6 }
  0x1d   :  { %455 = vmatprep.mubr.msk.bf16.mxu0 %vm535_vm0, %v534_v0  ;;  %424 = vmatpush3.bf16.msra.mxu1 %v467_v7 }
  0x1e   :  { %425 = vmatprep.subr.bf16.mxu1 %v534_v0  ;;  %440 = vmatpush3.bf16.msra.mxu0 %v473_v13  ;;  %p514_p11 = por %p513_p10, %p512_p9 }
  0x1f   :  { %441 = vmatprep.subr.bf16.mxu0 %v534_v0 }
  0x20   :  { %p515_p12 = pnand %p514_p11, %p508_p8 }
  0x21   :  { %426 = vmatpush3.bf16.msra.mxu1 %v468_v8 }
  0x22   :  { %427 = vmatprep.subr.bf16.mxu1 %v534_v0  ;;  %442 = vmatpush3.bf16.msra.mxu0 %v474_v14 }
  0x23   :  { %443 = vmatprep.subr.bf16.mxu0 %v534_v0 }
  0x25   :  { %428 = vmatpush3.bf16.msra.mxu1 %v469_v9 }
  0x26   :  { %429 = vmatprep.subr.bf16.mxu1 %v534_v0  ;;  %444 = vmatpush3.bf16.msra.mxu0 %v475_v15 }
  0x27   :  { %445 = vmatprep.subr.bf16.mxu0 %v534_v0 }
  0x29   :  { %430 = vmatpush3.bf16.msra.mxu1 %v470_v10 }
  0x2a   :  { %431 = vmatprep.subr.bf16.mxu1 %v534_v0  ;;  %446 = vmatpush3.bf16.msra.mxu0 %v476_v16 }
  0x2b   :  { %447 = vmatprep.subr.bf16.mxu0 %v534_v0 }
  0x2d   :  { %432 = vmatpush3.bf16.msra.mxu1 %v471_v11 }
  0x2e   :  { %433 = vmatprep.subr.bf16.mxu1 %v534_v0  ;;  %448 = vmatpush3.bf16.msra.mxu0 %v477_v17 }
  0x2f   :  { %449 = vmatprep.subr.bf16.mxu0 %v534_v0 }
  0x31   :  { %434 = vmatpush3.bf16.msra.mxu1 %v472_v12 }
  0x32   :  { %450 = vmatpush3.bf16.msra.mxu0 %v478_v18 }
  0x33   :  { %451 = vmatprep.subr.bf16.mxu0 %v534_v0 }
  0x36   :  { %452 = vmatpush3.bf16.msra.mxu0 %v479_v28 }
  0x37   :  { %453 = vmatprep.subr.bf16.mxu0 %v534_v0 }
  0x3a   :  { %454 = vmatpush3.bf16.msra.mxu0 %v480_v29 }
  0xef   :  { %v103_v20 = vpop.f32.mrb[0].mxu0 }
  0xf0   :  { %v104_v21 = vadd.f32 %v368_v19, %v103_v20  ;;  %v417_v22 = vpop.f32.mrb[1].mxu0 }
  0xf1   :  { %v106_v23 = vpop.f32.mrb[2].mxu0 }
  0xf2   :  { %vm109_vm2 = vcmp.gt.f32.partialorder %v104_v21, 0.0  ;;  %v110_v24 = vmul.f32 0.01, %v104_v21  ;;  %v418_v25 = vpop.f32.mrb[3].mxu0 }
  0xf4   :  { %v111_v26 = vsel %vm109_vm2, %v104_v21, %v110_v24 }
  0xf5   :  { %v112_v27 = vpack.c.bf16 %v111_v26, %v111_v26 }
  0xf7   :  { %436 = vmatmul.mubr.bf16.vlgmr.msra.gmra.mrb[0].mxu1 %v112_v27 }
 0x1ca   :  { %v218_v31 = vpop.f32.mrb[0].mxu1 }
 0x1cb   :  { %v219_v32 = vadd.f32 %v372_v30, %v218_v31  ;;  %v437_v33 = vpop.f32.mrb[1].mxu1 }
 0x1cc   :  { %v221_v34 = vpop.f32.mrb[2].mxu1 }
 0x1cd   :  { %vm224_vm3 = vcmp.gt.f32.partialorder %v219_v32, 0.0  ;;  %v225_v35 = vmul.f32 0.01, %v219_v32  ;;  %v438_v36 = vpop.f32.mrb[3].mxu1 }
 0x1cf   :  { %v226_v37 = vsel %vm224_vm3, %v219_v32, %v225_v35 }
 0x1d0   :  { %v227_v38 = vpack.c.bf16 %v226_v37, %v226_v37 }
 0x1d2   :  { %456 = vmatmul.mubr.bf16.vlgmr.msra.gmra.mrb[4].mxu0 %v227_v38 }
 0x2a5   :  { %v333_v40 = vpop.f32.mrb[4].mxu0 }
 0x2a6   :  { %v334_v41 = vadd.f32 %v381_v39, %v333_v40  ;;  %v457_v42 = vpop.f32.mrb[5].mxu0 }
 0x2a7   :  { %v336_v43 = vpop.f32.mrb[6].mxu0 }
 0x2a8   :  { %v458_v44 = vpop.f32.mrb[7].mxu0  ;;  %v340_v45 = vsel %vm339_vm4, %v334_v41, -inf }
 0x2a9   :  { %341 = vmax.xlane.f32.xlu0 %v340_v45 }
 0x336   :  { %v342_v46 = vpop.xlane.xlu0 %341 }
 0x337   :  { %v343_v47 = vsub.f32 %v334_v41, %v342_v46 }
 0x339   :  { %v344_v48 = vmul.f32 1.442695, %v343_v47 }
 0x33b   :  { %481 = vpow2.f32 %v344_v48 }
 0x345   :  { %v482_v49 = vpop.eup %481 }
 0x346   :  { %v346_v50 = vsel %vm339_vm4, %v482_v49, 0.0 }
 0x347   :  { %347 = vadd.xlane.f32.xlu0 %v346_v50 }
 0x3d4   :  { %v348_v51 = vpop.xlane.xlu0 %347 }
 0x3d5   :  { %483 = vlog2.f32 %v348_v51 }
 0x3df   :  { %v484_v52 = vpop.eup %483 }
 0x3e0   :  { %v350_v53 = vmul.f32 0.6931472, %v484_v52 }
 0x3e2   :  { %v351_v54 = vsub.f32 %v343_v47, %v350_v53 }
 0x3e4   :  { %352 = vst.msk [vmem:[#allocation5] sm:$0xff] %vm339_vm4, %v351_v54 }
 0x3e5   :  { %518 = shalt.err (!%p515_p12)
}
 0x3e6   :  { %s519_s28 = scalar_lea.hbm %s698_s7, 128 }
 0x3e7   :  { %p520_p13 = scmp.ne.s32.totalorder %s698_s7, %s519_s28  ;;  %p523_p0 = scmp.lt.u32.totalorder %s519_s28, %s698_s7 }
 0x3e9   :  { %p525_p1 = pnand %p523_p0, %p520_p13 }
 0x3eb   :  { %528 = shalt.err (!%p525_p1)
}
 0x3ec   :  { %362 = dma.vmem_to_hbm [thread:$0]  %s360_s5, 128, %s698_s7, [#allocation4]  }
 0x3ed   :  { %531 = dma.done.wait [#allocation4], 128  }
 0x3ee   :  { %532 = vsyncadd [#allocation4], 4294967168 }
 0x3ef   :  { %366 = vsyncpa [#allocation3], 1 }
 0x3f0   :  { %367 = vsyncpa [#allocation4], 1 }

</bundles_post_ra>
